<compile_context>
chip_gen: v7x
topology: tpu7x:2x2x1
jax: 0.10.0
libtpu: 0.0.40
codegen_flags: <defaults>
</compile_context>

<pallas_src>
import math

import jax
import jax.numpy as jnp
from jax.experimental import pallas as pl
from jax.experimental.pallas import tpu as pltpu


def _sinusoidal_init(max_len: int, d_model: int) -> jnp.ndarray:
    """Deterministic parameter init matching the PyTorch init_weights()."""
    position = jnp.arange(0, max_len, dtype=jnp.float32)[:, None]          # (max_len, 1)
    div_term = jnp.exp(
        jnp.arange(0, d_model, 2, dtype=jnp.float32)
        * -(math.log(10000.0) / d_model)
    )                                                                       # (d_model//2,)
    pe = jnp.zeros((max_len, d_model), dtype=jnp.float32)
    pe = pe.at[:, 0::2].set(jnp.sin(position * div_term))
    pe = pe.at[:, 1::2].set(jnp.cos(position * div_term))
    return pe


def _pe_add_kernel(x_ref, pe_ref, o_ref):
    # x_ref: (TB, TC) rows of flattened (S*D) features; pe_ref: (1, TC) in f32,
    # broadcast over the batch rows of this tile.  The cast is free (VPU slot,
    # kernel is DMA-bound); accumulate in f32, store in x's dtype.
    o_ref[...] = (x_ref[...].astype(jnp.float32) + pe_ref[...]).astype(o_ref.dtype)


_LANE = 128
_SUBLANE = {1: 32, 2: 16, 4: 8}      # packed sublane rows per 32-bit vreg row
_BLOCK_BYTES_TARGET = 4 << 20        # ~4 MiB x block: amortizes ~0.35 us/step overhead
_BLOCK_BYTES_MIN = 512 << 10         # don't shrink blocks below this just to add steps


def _pick_tiles(num_rows: int, num_cols: int, itemsize: int):
    """Byte-budget-driven block shape for the flattened (B, S*D) add.

    Rows (batch) are chosen first, then columns are sized so the x block hits
    the byte budget.  Each block dim is either hardware-aligned (sublane /
    128-lane multiple) or the full array extent, so cdiv edge blocks are legal.
    The budget is clamped to ~total/4 so large inputs produce >= ~4 grid steps
    (both v7x TensorCores get work) while small inputs stay a single block.
    """
    total_bytes = num_rows * num_cols * itemsize
    budget = min(_BLOCK_BYTES_TARGET, max(_BLOCK_BYTES_MIN, total_bytes // 4))
    sublane = _SUBLANE.get(itemsize, 8)

    # Rows: the whole batch if it fits the budget at the minimum lane width,
    # otherwise as many sublane-multiples of rows as the budget allows.
    min_tc = min(num_cols, _LANE)
    rows_fit = max(1, budget // (min_tc * itemsize))
    if num_rows <= rows_fit:
        tb = num_rows
    else:
        tb = min(num_rows, max(sublane, (rows_fit // sublane) * sublane))

    # Columns: budget / rows, floored to a lane multiple, capped at the extent.
    tc_budget = max(1, budget // (tb * itemsize))
    if tc_budget >= num_cols:
        tc = num_cols
    else:
        tc = min(num_cols, max(_LANE, (tc_budget // _LANE) * _LANE))
    return tb, tc


def _pe_add_pallas(x: jnp.ndarray, pe: jnp.ndarray) -> jnp.ndarray:
    """x: (B, S, D), pe: (max_len, D) f32.  Returns x + pe[:S, :] via Pallas."""
    B, S, D = x.shape
    max_len, d_model = pe.shape
    assert S <= max_len, f"sequence length {S} exceeds positional table {max_len}"
    assert D == d_model, f"d_model mismatch: x has {D}, pe has {d_model}"

    SD = S * D
    itemsize = jnp.dtype(x.dtype).itemsize

    # Lane-dense flattened operands.  pe[:S] is a contiguous prefix, so the
    # slice+reshape is layout plumbing (no astype / extra HBM pass here).
    x2 = x.reshape(B, SD)
    pe2 = pe[:S, :].astype(jnp.float32).reshape(1, SD)

    tb, tc = _pick_tiles(B, SD, itemsize)
    n_col = pl.cdiv(SD, tc)
    n_row = pl.cdiv(B, tb)

    # Column tiles are the OUTER grid axis, batch tiles the INNER one, so the
    # pe block index (column-only) is constant across the inner sweep and the
    # pe tile stays resident in VMEM.
    grid = (n_col, n_row)

    # Double-buffered x + out blocks plus the (f32) pe block, with margin.
    block_bytes = tb * tc * itemsize
    pe_block_bytes = tc * 4
    vmem_needed = 2 * (2 * block_bytes + pe_block_bytes)
    vmem_limit = int(min(48 << 20, max(32 << 20, vmem_needed + (4 << 20))))

    out2 = pl.pallas_call(
        _pe_add_kernel,
        out_shape=jax.ShapeDtypeStruct((B, SD), x.dtype),
        grid_spec=pltpu.PrefetchScalarGridSpec(
            num_scalar_prefetch=0,
            grid=grid,
            in_specs=[
                pl.BlockSpec((tb, tc), lambda c, b: (b, c)),
                pl.BlockSpec((1, tc), lambda c, b: (0, c)),
            ],
            out_specs=pl.BlockSpec((tb, tc), lambda c, b: (b, c)),
        ),
        compiler_params=pltpu.CompilerParams(
            dimension_semantics=("parallel", "parallel"),
            vmem_limit_bytes=vmem_limit,
        ),
    )(x2, pe2)

    return out2.reshape(B, S, D)


# Below ~2 MiB, pallas_call dispatch + per-step overhead loses to XLA's fused
# broadcast add (which can also fuse into neighboring elementwise ops).
_PALLAS_MIN_BYTES = 2 << 20


def learnable_positional_encoding(x: jnp.ndarray, pe: jnp.ndarray,
                                  *, min_bytes: int = _PALLAS_MIN_BYTES) -> jnp.ndarray:
    """x: (B, S, D), pe: (max_len, D).  Returns x + pe[:S, :] (broadcast over batch)."""
    B, S, D = x.shape
    if x.size * jnp.dtype(x.dtype).itemsize < min_bytes:
        return (x.astype(jnp.float32) + pe[:S, :][None, :, :]).astype(x.dtype)
    return _pe_add_pallas(x, pe)


if __name__ == "__main__":
    # Small shapes consistent with the module: batch=2, seq=8, d_model=32, max_len=16.
    d_model = 32
    max_len = 16
    batch = 2
    seq = 8

    key = jax.random.PRNGKey(0)
    x = jax.random.normal(key, (batch, seq, d_model), dtype=jnp.float32)
    pe = _sinusoidal_init(max_len, d_model)

    ref = x + pe[:seq, :][None, :, :]

    # 1) Force the Pallas path even at this tiny demo size.
    out = jax.block_until_ready(_pe_add_pallas(x, pe))
    assert out.shape == (batch, seq, d_model)
    assert jnp.allclose(out, ref, atol=1e-6, rtol=1e-6)

    # 2) Public wrapper (falls back to the fused XLA add below the size threshold).
    out2 = jax.block_until_ready(learnable_positional_encoding(x, pe))
    assert jnp.allclose(out2, ref, atol=1e-6, rtol=1e-6)

    # 3) A multi-block bf16 run exercising the cdiv partial edge block
    #    (B=48, S=16, D=640 -> SD=10240, column tile 5376, grid (2, 1)).
    k2 = jax.random.PRNGKey(0)
    xb = jax.random.normal(k2, (48, max_len, 640), dtype=jnp.bfloat16)
    peb = _sinusoidal_init(max_len, 640)
    outb = jax.block_until_ready(_pe_add_pallas(xb, peb))
    refb = (xb.astype(jnp.float32) + peb[None, :, :]).astype(jnp.bfloat16)
    assert outb.dtype == jnp.bfloat16
    assert jnp.allclose(outb.astype(jnp.float32), refb.astype(jnp.float32),
                        atol=1e-2, rtol=1e-2)

    print("KERNEL_OK")
</pallas_src>

<mosaic_0001>
module attributes {stable_mosaic.version = 11 : i64} {
  func.func @_pe_add_kernel(%arg0: i32, %arg1: i32, %arg2: memref<2x256xf32, #tpu.memory_space<vmem>>, %arg3: memref<1x256xf32, #tpu.memory_space<vmem>>, %arg4: memref<2x256xf32, #tpu.memory_space<vmem>>) attributes {dimension_semantics = [#tpu.dimension_semantics<parallel>, #tpu.dimension_semantics<parallel>], iteration_bounds = array<i64: 1, 1>, scalar_prefetch = 0 : i64, scratch_operands = 0 : i64, tpu.core_type = #tpu.core_type<tc>, window_params = [{transform_indices = @transform_0, window_bounds = array<i64: 2, 256>}, {transform_indices = @transform_1, window_bounds = array<i64: 1, 256>}, {transform_indices = @transform_2, window_bounds = array<i64: 2, 256>}]} {
    %c0 = arith.constant 0 : index
    %c0_0 = arith.constant 0 : index
    %0 = vector.load %arg2[%c0, %c0_0] : memref<2x256xf32, #tpu.memory_space<vmem>>, vector<2x256xf32>
    %c0_1 = arith.constant 0 : index
    %c0_2 = arith.constant 0 : index
    %1 = vector.load %arg3[%c0_1, %c0_2] : memref<1x256xf32, #tpu.memory_space<vmem>>, vector<1x256xf32>
    %2 = vector.broadcast %1 : vector<1x256xf32> to vector<2x256xf32>
    %3 = arith.addf %0, %2 : vector<2x256xf32>
    %c0_3 = arith.constant 0 : index
    %c0_4 = arith.constant 0 : index
    %4 = vector.load %arg4[%c0_3, %c0_4] : memref<2x256xf32, #tpu.memory_space<vmem>>, vector<2x256xf32>
    tpu.vector_store %arg4[%c0_3, %c0_4], %3 {strides = array<i32>} : memref<2x256xf32, #tpu.memory_space<vmem>>, vector<2x256xf32>,
    return
  }
  func.func @transform_0(%arg0: i32, %arg1: i32) -> (i32, i32) {
    %c0_i32 = arith.constant 0 : i32
    return %arg1, %arg0 : i32, i32
  }
  func.func @transform_1(%arg0: i32, %arg1: i32) -> (i32, i32) {
    %c0_i32 = arith.constant 0 : i32
    %c0_i32_0 = arith.constant 0 : i32
    return %c0_i32, %arg0 : i32, i32
  }
  func.func @transform_2(%arg0: i32, %arg1: i32) -> (i32, i32) {
    %c0_i32 = arith.constant 0 : i32
    return %arg1, %arg0 : i32, i32
  }
}

</mosaic_0001>

<bundles_post_ra>
// kernel: tpu_custom_call.1
= control target key start
LH: loop header
LB: loop body
LE: loop exit
PB: predicated region body
PF: predicated region fallthrough
CT: control target
= control target key end

     0   :  { %7 = vsyncpa [#allocation3], 0  ;;  %s157_s0 = inlined_call_operand.hbm [shape: f32[2,256], index: 0, kind: input, shape index: {}]   ;;  %s158_s1 = inlined_call_operand.vmem [shape: f32[1,256], index: 1, kind: input, shape index: {}]   ;;  %s159_s2 = inlined_call_operand.hbm [shape: f32[2,256], index: 2, kind: output, shape index: {}]  }
   0x1   :  { %8 = vsyncpa [#allocation4], 0  ;;  %s112_s9 = smov [#allocation2]   ;;  %s64_s13 = scalar_lea.hbm %s157_s0, 64 }
   0x2   :  { %s15_s10 = sshll.u32 %s112_s9, 4  ;;  %p65_p0 = scmp.ne.s32.totalorder %s157_s0, %s64_s13  ;;  %s16_s10 = int_to_ptr.vmem [resolvable:$true] %s15_s10 }
   0x3   :  { %p68_p1 = scmp.lt.u32.totalorder %s64_s13, %s157_s0 }
   0x5   :  { %p70_p2 = pnand %p68_p1, %p65_p0 }
   0x7   :  { %73 = shalt.err (!%p70_p2)
}
   0x8   :  { %s74_s18 = scalar_lea.vmem %s16_s10, 64  ;;  %p79_p4 = scmp.lt.s32.totalorder %s16_s10, %s16_s10 }
   0x9   :  { %p75_p3 = scmp.ne.s32.totalorder %s16_s10, %s74_s18  ;;  %p80_p5 = scmp.lt.s32.totalorder %s74_s18, %s74_s18 }
   0xb   :  { %p81_p6 = por %p80_p5, %p79_p4 }
   0xd   :  { %p82_p7 = pnand %p81_p6, %p75_p3 }
   0xf   :  { %85 = shalt.err (!%p82_p7)
}
  0x10   :  { %18 = dma.hbm_to_vmem [thread:$0]  %s157_s0, 64, %s16_s10, [#allocation3]  }
  0x11   :  { %108 = dma.done.wait [#allocation3], 64  }
  0x12   :  { %109 = vsyncadd [#allocation3], 4294967232  ;;  %v27_v0 = vlaneseq  ;;  %v113_v1 = vmov 1983009808   ;;  %v25_v7 = vld [vmem:[%s158_s1] sm:$0x3] }
  0x13   :  { %v37_v2 = vunpack.c.l.s4 %v113_v1  ;;  %v24_v12 = vld [vmem:[#allocation2] sm:$0xf]  ;;  %s114_s23 = smov [#allocation5]  }
  0x14   :  { %v28_v3 = vshrl.u32 %v27_v0, 7  ;;  %s52_s0 = sshll.u32 %s114_s23, 4  ;;  %s53_s0 = int_to_ptr.vmem [resolvable:$true] %s52_s0 }
  0x15   :  { %v38_v6 = vunpack.c.0.s8 %v37_v2  ;;  %s86_s24 = scalar_lea.vmem %s53_s0, 64  ;;  %p91_p9 = scmp.lt.s32.totalorder %s53_s0, %s53_s0 }
  0x16   :  { %v29_v4 = vsub.s32 0, %v28_v3  ;;  %v33_v5 = vsub.s32 1, %v28_v3  ;;  %p87_p8 = scmp.ne.s32.totalorder %s53_s0, %s86_s24  ;;  %p92_p10 = scmp.lt.s32.totalorder %s86_s24, %s86_s24 }
  0x17   :  { %v41_v10 = vsub.s32 %v38_v6, %v28_v3 }
  0x18   :  { %v30_v8 = vrot.slane %v25_v7, %v29_v4  ;;  %v34_v9 = vrot.slane %v25_v7, %v33_v5  ;;  %p93_p11 = por %p92_p10, %p91_p9 }
  0x1a   :  { %v35_v11 = vcombine.low %v30_v8, %v34_v9  ;;  %p94_p12 = pnand %p93_p11, %p87_p8 }
  0x1c   :  { %v42_v13 = vrot.slane %v35_v11, %v41_v10 }
  0x1e   :  { %v44_v14 = vadd.f32 %v42_v13, %v24_v12 }
  0x20   :  { %45 = vst [vmem:[#allocation5] sm:$0xf] %v44_v14 }
  0x21   :  { %97 = shalt.err (!%p94_p12)
}
  0x22   :  { %s98_s26 = scalar_lea.hbm %s159_s2, 64 }
  0x23   :  { %p99_p13 = scmp.ne.s32.totalorder %s159_s2, %s98_s26  ;;  %p102_p0 = scmp.lt.u32.totalorder %s98_s26, %s159_s2 }
  0x25   :  { %p104_p1 = pnand %p102_p0, %p99_p13 }
  0x27   :  { %107 = shalt.err (!%p104_p1)
}
  0x28   :  { %55 = dma.vmem_to_hbm [thread:$0]  %s53_s0, 64, %s159_s2, [#allocation4]  }
  0x29   :  { %110 = dma.done.wait [#allocation4], 64  }
  0x2a   :  { %111 = vsyncadd [#allocation4], 4294967232 }
  0x2b   :  { %59 = vsyncpa [#allocation3], 1 }
  0x2c   :  { %60 = vsyncpa [#allocation4], 1 }

</bundles_post_ra>
